<compile_context>
chip_gen: v7x
topology: tpu7x:2x2x1
jax: 0.10.0
libtpu: 0.0.40
codegen_flags: <defaults>
</compile_context>

<pallas_src>
import functools

import jax
import jax.numpy as jnp
from jax import lax
from jax.experimental import pallas as pl
from jax.experimental.pallas import tpu as pltpu


def _round_up(n, m):
    return ((n + m - 1) // m) * m


def _default_tile_n(n):
    # Large sublane/lane-dense tiles amortize the ~0.35us per-grid-step cost;
    # cap at 1024 rows so an f32 [1024, L] x-tile (4 MiB for L=1024) stays
    # comfortably double-buffered inside v7x's 64 MiB VMEM, and so N > 1024
    # gives a multi-step "parallel" grid for the second TensorCore.
    if n <= 1024:
        return min(1024, _round_up(max(n, 1), 128))
    return 1024


def gated_attn_kernel(x_ref, wab_ref, bab_ref, wc_ref, bc_ref, at_ref):
    x = x_ref[...]                                     # [tile_n, L]
    # Fused gate projection: one MXU matmul for both attention_a / attention_b.
    h = jnp.dot(x, wab_ref[...], preferred_element_type=jnp.float32)
    h = h + bab_ref[...]                               # [tile_n, 2D]
    d = wab_ref.shape[1] // 2
    a = jnp.tanh(h[:, :d])                             # attention_a: Tanh
    b = jax.nn.sigmoid(h[:, d:])                       # attention_b: Sigmoid
    g = a * b                                          # [tile_n, D]
    # attention_c, emitted transposed so the store is lane-dense:
    #   A^T = Wc @ g^T  ->  [C, tile_n]
    at = lax.dot_general(
        wc_ref[...], g,
        dimension_numbers=(((1,), (1,)), ((), ())),
        preferred_element_type=jnp.float32)
    at_ref[...] = (at + bc_ref[...]).astype(at_ref.dtype)


def prepare_attn_net_gated_params(wa, ba, wb, bb, wc, bc,
                                  *, ard_init=-1.0, thresh=3.0):
    """One-time parameter prep (hoisted out of the per-call path).

    wa/wb: [D, L], ba/bb: [D], wc: [C, D], bc: [C]  (PyTorch layout).
    """
    # LinearVDO inference-time clipping: zero weights where log_alpha > thresh.
    # With ard_init=-1.0 this mask is all-False; kept for semantic fidelity.
    def _clip(w):
        log_alpha = jnp.full(w.shape, ard_init, dtype=w.dtype)
        return jnp.where(log_alpha > thresh, jnp.zeros_like(w), w)

    wa, wb, wc = _clip(wa), _clip(wb), _clip(wc)
    D = wa.shape[0]
    C = wc.shape[0]
    wab_t = jnp.concatenate([wa.T, wb.T], axis=1)       # [L, 2D]
    bab = jnp.concatenate([ba, bb]).reshape(1, 2 * D)   # [1, 2D]
    bc_col = bc.reshape(C, 1)                           # [C, 1]
    return wab_t, bab, wc, bc_col


def attn_net_gated_forward(x, params, *, tile_n=None):
    """x: [N, L]; params from prepare_attn_net_gated_params.
    Returns (A [N, C], x) exactly like the PyTorch module."""
    wab_t, bab, wc, bc_col = params
    N, L = x.shape
    two_d = wab_t.shape[1]
    C, D = wc.shape

    if tile_n is None:
        tile_n = _default_tile_n(N)
    n_pad = _round_up(N, tile_n)
    x_pad = x if n_pad == N else jnp.pad(x, ((0, n_pad - N), (0, 0)))
    grid = (n_pad // tile_n,)

    full = lambda shape: pl.BlockSpec(shape, lambda i: (0, 0))

    a_t = pl.pallas_call(
        gated_attn_kernel,
        out_shape=jax.ShapeDtypeStruct((C, n_pad), x.dtype),
        grid_spec=pltpu.PrefetchScalarGridSpec(
            num_scalar_prefetch=0,
            grid=grid,
            in_specs=[
                pl.BlockSpec((tile_n, L), lambda i: (i, 0)),  # x tile
                full((L, two_d)),                             # [Wa^T | Wb^T]
                full((1, two_d)),                             # [ba | bb]
                full((C, D)),                                 # Wc
                full((C, 1)),                                 # bc
            ],
            out_specs=pl.BlockSpec((C, tile_n), lambda i: (0, i)),  # A^T tile
        ),
        compiler_params=pltpu.CompilerParams(
            dimension_semantics=("parallel",)),
    )(x_pad, wab_t, bab, wc, bc_col)

    A = a_t[:, :N].T                                    # [N, C]
    return A, x


def _reference(x, wa, ba, wb, bb, wc, bc):
    hi = lax.Precision.HIGHEST
    a = jnp.tanh(jnp.dot(x, wa.T, precision=hi) + ba)
    b = jax.nn.sigmoid(jnp.dot(x, wb.T, precision=hi) + bb)
    return jnp.dot(a * b, wc.T, precision=hi) + bc


if __name__ == "__main__":
    # Small shapes consistent with the module: L=32 in-features, D=16 hidden,
    # n_classes=1, N=16 instances in the bag (N need not divide the tile).
    N, L, D, C = 16, 32, 16, 1
    key = jax.random.PRNGKey(0)
    kx, k1, k2, k3, k4, k5, k6 = jax.random.split(key, 7)

    x = jax.random.normal(kx, (N, L), dtype=jnp.float32)
    wa = jax.random.normal(k1, (D, L), dtype=jnp.float32) / jnp.sqrt(L)
    ba = jax.random.normal(k2, (D,), dtype=jnp.float32) * 0.01
    wb = jax.random.normal(k3, (D, L), dtype=jnp.float32) / jnp.sqrt(L)
    bb = jax.random.normal(k4, (D,), dtype=jnp.float32) * 0.01
    wc = jax.random.normal(k5, (C, D), dtype=jnp.float32) / jnp.sqrt(D)
    bc = jax.random.normal(k6, (C,), dtype=jnp.float32) * 0.01

    # Parameter prep done once (hoisted out of the per-call path).
    params = prepare_attn_net_gated_params(wa, ba, wb, bb, wc, bc)
    params = jax.tree_util.tree_map(jax.block_until_ready, params)

    fwd = jax.jit(functools.partial(attn_net_gated_forward, params=params))
    A, x_out = fwd(x)
    A = jax.block_until_ready(A)
    x_out = jax.block_until_ready(x_out)

    A_ref = _reference(x, wa, ba, wb, bb, wc, bc)
    assert A.shape == (N, C), A.shape
    assert x_out.shape == (N, L), x_out.shape
    assert jnp.allclose(A, A_ref, atol=1e-4, rtol=1e-4), (
        float(jnp.max(jnp.abs(A - A_ref))))
    assert jnp.array_equal(x_out, x)

    # TODO(synk): dropout branch (dropout=True) and LinearVDO's stochastic /
    # KL training path are not part of the inference forward and are omitted.
    print("KERNEL_OK")
</pallas_src>

<mosaic_0001>
module attributes {stable_mosaic.version = 11 : i64} {
  func.func @gated_attn_kernel(%arg0: i32, %arg1: memref<128x32xf32, #tpu.memory_space<vmem>>, %arg2: memref<32x32xf32, #tpu.memory_space<vmem>>, %arg3: memref<1x32xf32, #tpu.memory_space<vmem>>, %arg4: memref<1x16xf32, #tpu.memory_space<vmem>>, %arg5: memref<1x1xf32, #tpu.memory_space<vmem>>, %arg6: memref<1x128xf32, #tpu.memory_space<vmem>>) attributes {dimension_semantics = [#tpu.dimension_semantics<parallel>], iteration_bounds = array<i64: 1>, scalar_prefetch = 0 : i64, scratch_operands = 0 : i64, tpu.core_type = #tpu.core_type<tc>, window_params = [{transform_indices = @transform_0, window_bounds = array<i64: 128, 32>}, {pipeline_mode = #tpu.pipeline_mode<synchronous>, transform_indices = @transform_1, window_bounds = array<i64: 32, 32>}, {pipeline_mode = #tpu.pipeline_mode<synchronous>, transform_indices = @transform_2, window_bounds = array<i64: 1, 32>}, {pipeline_mode = #tpu.pipeline_mode<synchronous>, transform_indices = @transform_3, window_bounds = array<i64: 1, 16>}, {pipeline_mode = #tpu.pipeline_mode<synchronous>, transform_indices = @transform_4, window_bounds = array<i64: 1, 1>}, {transform_indices = @transform_5, window_bounds = array<i64: 1, 128>}]} {
    %c0 = arith.constant 0 : index
    %c0_0 = arith.constant 0 : index
    %0 = vector.load %arg1[%c0, %c0_0] : memref<128x32xf32, #tpu.memory_space<vmem>>, vector<128x32xf32>
    %c0_1 = arith.constant 0 : index
    %c0_2 = arith.constant 0 : index
    %1 = vector.load %arg2[%c0_1, %c0_2] : memref<32x32xf32, #tpu.memory_space<vmem>>, vector<32x32xf32>
    %cst = arith.constant dense<0.000000e+00> : vector<128x32xf32>
    %2 = tpu.matmul %0, %1, %cst {dimension_numbers = #tpu.dot_dimension_numbers<[1], [0], [0], [1], [0, 0, 1, 1], [], []>} : vector<128x32xf32>, vector<32x32xf32>, vector<128x32xf32> -> vector<128x32xf32>
    %c0_3 = arith.constant 0 : index
    %c0_4 = arith.constant 0 : index
    %3 = vector.load %arg3[%c0_3, %c0_4] : memref<1x32xf32, #tpu.memory_space<vmem>>, vector<1x32xf32>
    %4 = vector.broadcast %3 : vector<1x32xf32> to vector<128x32xf32>
    %5 = arith.addf %2, %4 : vector<128x32xf32>
    %6 = vector.extract_strided_slice %5 {offsets = [0, 0], sizes = [128, 16], strides = [1, 1]} : vector<128x32xf32> to vector<128x16xf32>
    %7 = math.tanh %6 : vector<128x16xf32>
    %8 = vector.extract_strided_slice %5 {offsets = [0, 16], sizes = [128, 16], strides = [1, 1]} : vector<128x32xf32> to vector<128x16xf32>
    %9 = arith.negf %8 : vector<128x16xf32>
    %10 = math.exp %9 : vector<128x16xf32>
    %cst_5 = arith.constant 1.000000e+00 : f32
    %11 = vector.broadcast %cst_5 : f32 to vector<128x16xf32>
    %12 = arith.addf %11, %10 : vector<128x16xf32>
    %13 = arith.divf %11, %12 : vector<128x16xf32>
    %14 = arith.mulf %7, %13 : vector<128x16xf32>
    %c0_6 = arith.constant 0 : index
    %c0_7 = arith.constant 0 : index
    %15 = vector.load %arg4[%c0_6, %c0_7] : memref<1x16xf32, #tpu.memory_space<vmem>>, vector<1x16xf32>
    %cst_8 = arith.constant dense<0.000000e+00> : vector<1x128xf32>
    %16 = tpu.matmul %15, %14, %cst_8 {dimension_numbers = #tpu.dot_dimension_numbers<[1], [1], [0], [0], [0, 0, 1, 0], [], []>} : vector<1x16xf32>, vector<128x16xf32>, vector<1x128xf32> -> vector<1x128xf32>
    %c0_9 = arith.constant 0 : index
    %c0_10 = arith.constant 0 : index
    %17 = vector.load %arg5[%c0_9, %c0_10] : memref<1x1xf32, #tpu.memory_space<vmem>>, vector<1x1xf32>
    %18 = vector.broadcast %17 : vector<1x1xf32> to vector<1x128xf32>
    %19 = arith.addf %16, %18 : vector<1x128xf32>
    %c0_11 = arith.constant 0 : index
    %c0_12 = arith.constant 0 : index
    %20 = vector.load %arg6[%c0_11, %c0_12] : memref<1x128xf32, #tpu.memory_space<vmem>>, vector<1x128xf32>
    tpu.vector_store %arg6[%c0_11, %c0_12], %19 {strides = array<i32>} : memref<1x128xf32, #tpu.memory_space<vmem>>, vector<1x128xf32>,
    return
  }
  func.func @transform_0(%arg0: i32) -> (i32, i32) {
    %c0_i32 = arith.constant 0 : i32
    %c0_i32_0 = arith.constant 0 : i32
    return %arg0, %c0_i32 : i32, i32
  }
  func.func @transform_1(%arg0: i32) -> (i32, i32) {
    %c0_i32 = arith.constant 0 : i32
    %c0_i32_0 = arith.constant 0 : i32
    %c0_i32_1 = arith.constant 0 : i32
    return %c0_i32, %c0_i32_0 : i32, i32
  }
  func.func @transform_2(%arg0: i32) -> (i32, i32) {
    %c0_i32 = arith.constant 0 : i32
    %c0_i32_0 = arith.constant 0 : i32
    %c0_i32_1 = arith.constant 0 : i32
    return %c0_i32, %c0_i32_0 : i32, i32
  }
  func.func @transform_3(%arg0: i32) -> (i32, i32) {
    %c0_i32 = arith.constant 0 : i32
    %c0_i32_0 = arith.constant 0 : i32
    %c0_i32_1 = arith.constant 0 : i32
    return %c0_i32, %c0_i32_0 : i32, i32
  }
  func.func @transform_4(%arg0: i32) -> (i32, i32) {
    %c0_i32 = arith.constant 0 : i32
    %c0_i32_0 = arith.constant 0 : i32
    %c0_i32_1 = arith.constant 0 : i32
    return %c0_i32, %c0_i32_0 : i32, i32
  }
  func.func @transform_5(%arg0: i32) -> (i32, i32) {
    %c0_i32 = arith.constant 0 : i32
    %c0_i32_0 = arith.constant 0 : i32
    return %c0_i32, %arg0 : i32, i32
  }
}

</mosaic_0001>

<bundles_post_ra>
// kernel: attn_net_gated_forward.1
= control target key start
LH: loop header
LB: loop body
LE: loop exit
PB: predicated region body
PF: predicated region fallthrough
CT: control target
= control target key end

     0   :  { %vm49_vm0 = vcmask 261120   ;;  %vm871_vm1 = vmmov 0   ;;  %vm446_vm2 = vcmask 130048   ;;  %s1121_s1 = inlined_call_operand.vmem [shape: f32[32,32], index: 1, kind: input, shape index: {}]   ;;  %s1122_s0 = inlined_call_operand.vmem [shape: f32[128,32], index: 0, kind: input, shape index: {}]   ;;  %s1123_s2 = inlined_call_operand.vmem [shape: f32[1,32], index: 2, kind: input, shape index: {}]   ;;  %s1124_s4 = inlined_call_operand.<no memory space> [shape: f32[1,1], index: 4, kind: input, shape index: {}]   ;;  %s1125_s3 = inlined_call_operand.vmem [shape: f32[1,16], index: 3, kind: input, shape index: {}]   ;;  %s1126_s5 = inlined_call_operand.vmem [shape: f32[1,128], index: 5, kind: output, shape index: {}]  }
   0x1   :  { %v38_v0 = vld [vmem:[%s1121_s1] sm:$0xff]  ;;  %v39_v1 = vld [vmem:[%s1121_s1 + $0x8] sm:$0xff]  ;;  %v40_v2 = vld [vmem:[%s1121_s1 + $0x10] sm:$0xff] }
   0x2   :  { %v727_v3 = vpack.c.bf16 %v39_v1, %v38_v0  ;;  %v41_v4 = vld [vmem:[%s1121_s1 + $0x18] sm:$0xff]  ;;  %v22_v5 = vld [vmem:[%s1122_s0] sm:$0xff]  ;;  %v23_v7 = vld [vmem:[%s1122_s0 + $0x8] sm:$0xff] }
   0x3   :  { %v731_v6 = vpack.c.bf16 %v41_v4, %v40_v2  ;;  %668 = vmatprep.mubr.msk.f32.mxu0 %vm49_vm0, %v22_v5  ;;  %v24_v8 = vld [vmem:[%s1122_s0 + $0x10] sm:$0xff]  ;;  %v25_v9 = vld [vmem:[%s1122_s0 + $0x18] sm:$0xff]  ;;  %v26_v10 = vld [vmem:[%s1122_s0 + $0x20] sm:$0xff] }
   0x4   :  { %728 = vmatprep.subr.bf16.mxu0 %v727_v3  ;;  %v27_v11 = vld [vmem:[%s1122_s0 + $0x28] sm:$0xff]  ;;  %v28_v12 = vld [vmem:[%s1122_s0 + $0x30] sm:$0xff]  ;;  %v29_v13 = vld [vmem:[%s1122_s0 + $0x38] sm:$0xff] }
   0x5   :  { %730 = vmatpush3.bf16.msra.mxu0 %v727_v3  ;;  %v30_v14 = vld [vmem:[%s1122_s0 + $0x40] sm:$0xff]  ;;  %v31_v15 = vld [vmem:[%s1122_s0 + $0x48] sm:$0xff]  ;;  %v32_v16 = vld [vmem:[%s1122_s0 + $0x50] sm:$0xff]  ;;  %v869_v3 = vmov 0.0|0.0  }
   0x6   :  { %732 = vmatprep.subr.bf16.mxu0 %v731_v6  ;;  %v33_v17 = vld [vmem:[%s1122_s0 + $0x58] sm:$0xff]  ;;  %v34_v18 = vld [vmem:[%s1122_s0 + $0x60] sm:$0xff]  ;;  %v35_v19 = vld [vmem:[%s1122_s0 + $0x68] sm:$0xff]  ;;  %735 = vmatprep.subr.bf16.mxu1 %v869_v3 }
   0x7   :  { %v36_v20 = vld [vmem:[%s1122_s0 + $0x70] sm:$0xff]  ;;  %v37_v21 = vld [vmem:[%s1122_s0 + $0x78] sm:$0xff]  ;;  %v983_v22 = vld [vmem:[%s1123_s2] ss:$0 sm:$0xff]  ;;  %s870_s0 = smov 112  }
   0x8   :  { %vm1079_vm3 = vmpackc.low %vm446_vm2, %vm446_vm2 }
   0x9   :  { %734 = vmatpush3.bf16.msra.mxu0 %v731_v6 }
   0xc   :  { %669 = vmatmul.mubr.msk.f32.vlgmr.msra.gmra.mrb[0].mxu0 %vm49_vm0, %v23_v7 }
   0xd   :  { %671 = vmatprep.mubr.msk.f32.mxu0 %vm49_vm0, %v24_v8 }
  0x10   :  { %672 = vmatmul.mubr.msk.f32.gmra.mrb[2].mxu0 %vm49_vm0, %v25_v9 }
  0x11   :  { %674 = vmatprep.mubr.msk.f32.mxu0 %vm49_vm0, %v26_v10 }
  0x14   :  { %675 = vmatmul.mubr.msk.f32.gmra.mrb[4].mxu0 %vm49_vm0, %v27_v11 }
  0x15   :  { %677 = vmatprep.mubr.msk.f32.mxu0 %vm49_vm0, %v28_v12 }
  0x18   :  { %678 = vmatmul.mubr.msk.f32.gmra.mrb[6].mxu0 %vm49_vm0, %v29_v13 }
  0x19   :  { %680 = vmatprep.mubr.msk.f32.mxu0 %vm49_vm0, %v30_v14 }
  0x1c   :  { %681 = vmatmul.mubr.msk.f32.gmra.mrb[8].mxu0 %vm49_vm0, %v31_v15 }
  0x1d   :  { %683 = vmatprep.mubr.msk.f32.mxu0 %vm49_vm0, %v32_v16 }
  0x20   :  { %684 = vmatmul.mubr.msk.f32.gmra.mrb[10].mxu0 %vm49_vm0, %v33_v17 }
  0x21   :  { %686 = vmatprep.mubr.msk.f32.mxu0 %vm49_vm0, %v34_v18 }
  0x24   :  { %687 = vmatmul.mubr.msk.f32.gmra.mrb[12].mxu0 %vm49_vm0, %v35_v19 }
  0x25   :  { %689 = vmatprep.mubr.msk.f32.mxu0 %vm49_vm0, %v36_v20 }
  0x28   :  { %690 = vmatmul.mubr.msk.f32.gmra.mrb[14].mxu0 %vm49_vm0, %v37_v21 }
  0xdf   :  { %v670_v23 = vpop.f32.mrb[0].mxu0 }
  0xe0   :  { %v986_v24 = vadd.f32 %v670_v23, %v983_v22  ;;  %v164_v25 = vpop.f32.mrb[1].mxu0 }
  0xe1   :  { %v989_v26 = vadd.f32 %v983_v22, %v164_v25 }
  0xe2   :  { %v591_v27 = vmul.f32 -1.442695, %v986_v24 }
  0xe3   :  { %v590_v28 = vmul.f32 -1.442695, %v989_v26  ;;  %v673_v29 = vpop.f32.mrb[2].mxu0 }
  0xe4   :  { %773 = vpow2.f32 %v591_v27  ;;  %v994_v30 = vadd.f32 %v673_v29, %v983_v22  ;;  %v174_v31 = vpop.f32.mrb[3].mxu0 }
  0xe5   :  { %775 = vpow2.f32 %v590_v28  ;;  %v997_v32 = vadd.f32 %v983_v22, %v174_v31 }
  0xe6   :  { %v593_v33 = vmul.f32 -1.442695, %v994_v30 }
  0xe7   :  { %v592_v34 = vmul.f32 -1.442695, %v997_v32  ;;  %v676_v35 = vpop.f32.mrb[4].mxu0 }
  0xe8   :  { %777 = vpow2.f32 %v593_v33  ;;  %v1002_v36 = vadd.f32 %v676_v35, %v983_v22  ;;  %v184_v37 = vpop.f32.mrb[5].mxu0 }
  0xe9   :  { %779 = vpow2.f32 %v592_v34  ;;  %v1005_v38 = vadd.f32 %v983_v22, %v184_v37 }
  0xea   :  { %v595_v39 = vmul.f32 -1.442695, %v1002_v36 }
  0xeb   :  { %v594_v40 = vmul.f32 -1.442695, %v1005_v38  ;;  %v679_v41 = vpop.f32.mrb[6].mxu0 }
  0xec   :  { %781 = vpow2.f32 %v595_v39  ;;  %v1010_v42 = vadd.f32 %v679_v41, %v983_v22  ;;  %v194_v43 = vpop.f32.mrb[7].mxu0 }
  0xed   :  { %783 = vpow2.f32 %v594_v40  ;;  %v1013_v44 = vadd.f32 %v983_v22, %v194_v43 }
  0xee   :  { %v774_v45 = vpop.eup %773  ;;  %v597_v46 = vmul.f32 -1.442695, %v1010_v42 }
  0xef   :  { %v776_v47 = vpop.eup %775  ;;  %v596_v48 = vmul.f32 -1.442695, %v1013_v44  ;;  %v682_v49 = vpop.f32.mrb[8].mxu0  ;;  %v308_v53 = vadd.f32 1.0, %v774_v45 }
  0xf0   :  { %v307_v50 = vadd.f32 1.0, %v776_v47  ;;  %785 = vpow2.f32 %v597_v46  ;;  %v1018_v51 = vadd.f32 %v682_v49, %v983_v22  ;;  %v204_v52 = vpop.f32.mrb[9].mxu0 }
  0xf1   :  { %v1022_v57 = vadd.f32 %v983_v22, %v204_v52 }
  0xf2   :  { %v778_v54 = vpop.eup %777  ;;  %787 = vrcp.f32 %v307_v50  ;;  %v599_v56 = vmul.f32 -1.442695, %v1018_v51 }
  0xf3   :  { %v780_v55 = vpop.eup %779  ;;  %789 = vpow2.f32 %v596_v48  ;;  %v685_v58 = vpop.f32.mrb[10].mxu0  ;;  %v310_v59 = vadd.f32 1.0, %v778_v54  ;;  %v598_v1 = vmul.f32 -1.442695, %v1022_v57 }
  0xf4   :  { %v309_v60 = vadd.f32 1.0, %v780_v55  ;;  %v214_v61 = vpop.f32.mrb[11].mxu0  ;;  %791 = vrcp.f32 %v308_v53  ;;  %v1025_v63 = vadd.f32 %v685_v58, %v983_v22 }
  0xf5   :  { %v1030_v7 = vadd.f32 %v983_v22, %v214_v61 }
  0xf6   :  { %v782_v62 = vpop.eup %781  ;;  %793 = vrcp.f32 %v309_v60  ;;  %v601_v9 = vmul.f32 -1.442695, %v1025_v63 }
  0xf7   :  { %v784_v0 = vpop.eup %783  ;;  %795 = vpow2.f32 %v599_v56  ;;  %v688_v2 = vpop.f32.mrb[12].mxu0  ;;  %v312_v4 = vadd.f32 1.0, %v782_v62  ;;  %v600_v16 = vmul.f32 -1.442695, %v1030_v7 }
  0xf8   :  { %797 = vrcp.f32 %v310_v59  ;;  %v311_v5 = vadd.f32 1.0, %v784_v0  ;;  %v224_v6 = vpop.f32.mrb[13].mxu0  ;;  %v1034_v11 = vadd.f32 %v688_v2, %v983_v22 }
  0xf9   :  { %v1039_v18 = vadd.f32 %v983_v22, %v224_v6  ;;  %v10_v6 = vstv %s1124_s4 }
  0xfa   :  { %v786_v8 = vpop.eup %785  ;;  %799 = vrcp.f32 %v311_v5  ;;  %v603_v20 = vmul.f32 -1.442695, %v1034_v11  ;;  %v873_v5 = vmov 0   ;;  %11 = vst [vmem:[#allocation2] sm:$0x1] %v10_v6 }
  0xfb   :  { %v314_v10 = vadd.f32 1.0, %v786_v8  ;;  %801 = vpow2.f32 %v598_v1  ;;  %v691_v12 = vpop.f32.mrb[14].mxu0  ;;  %v602_v29 = vmul.f32 -1.442695, %v1039_v18  ;;  %772 = vset.pattern.permute.xlu0 %v873_v5 }
  0xfc   :  { %v788_v13 = vpop.eup %787  ;;  %803 = vrcp.f32 %v312_v4  ;;  %v234_v14 = vpop.f32.mrb[15].mxu0  ;;  %v1043_v25 = vadd.f32 %v691_v12, %v983_v22  ;;  %v872_v4 = vmov 0.0  }
  0xfd   :  { %v790_v15 = vpop.eup %789  ;;  %371 = vrot.lane.b32.xlu0 %v788_v13, %s870_s0  ;;  %805 = vpow2.f32 %v601_v9  ;;  %v1049_v33 = vadd.f32 %v983_v22, %v234_v14  ;;  %724 = vmatprep.mubr.msk.f32.mxu1 %vm871_vm1, %v872_v4 }
  0xfe   :  { %v313_v17 = vadd.f32 1.0, %v790_v15  ;;  %v792_v19 = vpop.eup %791  ;;  %807 = vrcp.f32 %v314_v10  ;;  %v605_v35 = vmul.f32 -1.442695, %v1043_v25 }
  0xff   :  { %v604_v41 = vmul.f32 -1.442695, %v1049_v33 }
 0x100   :  { %v794_v21 = vpop.eup %793  ;;  %809 = vrcp.f32 %v313_v17 }
 0x101   :  { %v796_v23 = vpop.eup %795  ;;  %811 = vpow2.f32 %v600_v16  ;;  %375 = vrot.lane.b32.xlu1 %v794_v21, %s870_s0  ;;  %373 = vrot.lane.b32.xlu0 %v792_v19, %s870_s0  ;;  %v436_v8 = vld [vmem:[#allocation2] sm:$0x1] }
 0x102   :  { %v798_v27 = vpop.eup %797  ;;  %v316_v28 = vadd.f32 1.0, %v796_v23  ;;  %813 = vpow2.f32 %v603_v20 }
 0x104   :  { %v800_v31 = vpop.eup %799  ;;  %815 = vrcp.f32 %v316_v28 }
 0x105   :  { %v802_v34 = vpop.eup %801  ;;  %377 = vrot.lane.b32.xlu1 %v798_v27, %s870_s0  ;;  %379 = vrot.lane.b32.xlu0 %v800_v31, %s870_s0  ;;  %817 = vpow2.f32 %v602_v29 }
 0x106   :  { %v804_v37 = vpop.eup %803  ;;  %v315_v39 = vadd.f32 1.0, %v802_v34 }
 0x107   :  { %v806_v40 = vpop.eup %805 }
 0x108   :  { %819 = vrcp.f32 %v315_v39  ;;  %v808_v43 = vpop.eup %807  ;;  %v318_v45 = vadd.f32 1.0, %v806_v40 }
 0x109   :  { %821 = vpow2.f32 %v605_v35  ;;  %381 = vrot.lane.b32.xlu1 %v804_v37, %s870_s0 }
 0x10a   :  { %v810_v22 = vpop.eup %809  ;;  %823 = vrcp.f32 %v318_v45 }
 0x10b   :  { %v812_v46 = vpop.eup %811  ;;  %383 = vrot.lane.b32.xlu0 %v810_v22, %s870_s0  ;;  %825 = vpow2.f32 %v604_v41 }
 0x10c   :  { %v317_v47 = vadd.f32 1.0, %v812_v46  ;;  %v814_v48 = vpop.eup %813 }
 0x10d   :  { %385 = vrot.lane.b32.xlu1 %v808_v43, %s870_s0  ;;  %v320_v50 = vadd.f32 1.0, %v814_v48 }
 0x10e   :  { %v816_v49 = vpop.eup %815  ;;  %827 = vrcp.f32 %v317_v47 }
 0x10f   :  { %v818_v52 = vpop.eup %817  ;;  %829 = vrcp.f32 %v320_v50 }
 0x110   :  { %v319_v53 = vadd.f32 1.0, %v818_v52 }
 0x111   :  { %389 = vrot.lane.b32.xlu1 %v816_v49, %s870_s0 }
 0x112   :  { %v820_v54 = vpop.eup %819  ;;  %831 = vrcp.f32 %v319_v53 }
 0x113   :  { %v822_v55 = vpop.eup %821  ;;  %387 = vrot.lane.b32.xlu0 %v820_v54, %s870_s0 }
 0x114   :  { %v322_v56 = vadd.f32 1.0, %v822_v55  ;;  %v824_v58 = vpop.eup %823 }
 0x115   :  { %v826_v59 = vpop.eup %825  ;;  %393 = vrot.lane.b32.xlu1 %v824_v58, %s870_s0 }
 0x116   :  { %833 = vrcp.f32 %v322_v56  ;;  %v321_v60 = vadd.f32 1.0, %v826_v59 }
 0x118   :  { %v828_v61 = vpop.eup %827  ;;  %835 = vrcp.f32 %v321_v60 }
 0x119   :  { %391 = vrot.lane.b32.xlu0 %v828_v61, %s870_s0  ;;  %v830_v62 = vpop.eup %829  ;;  %837 = vtanh.f32 %v986_v24 }
 0x11a   :  { %397 = vrot.lane.b32.xlu1 %v830_v62, %s870_s0  ;;  %839 = vtanh.f32 %v989_v26 }
 0x11b   :  { %841 = vtanh.f32 %v994_v30 }
 0x11c   :  { %v832_v0 = vpop.eup %831  ;;  %843 = vtanh.f32 %v997_v32 }
 0x11d   :  { %395 = vrot.lane.b32.xlu0 %v832_v0, %s870_s0  ;;  %845 = vtanh.f32 %v1002_v36 }
 0x11e   :  { %847 = vtanh.f32 %v1005_v38 }
 0x11f   :  { %849 = vtanh.f32 %v1010_v42 }
 0x120   :  { %v834_v1 = vpop.eup %833  ;;  %851 = vtanh.f32 %v1013_v44 }
 0x121   :  { %401 = vrot.lane.b32.xlu1 %v834_v1, %s870_s0  ;;  %853 = vtanh.f32 %v1018_v51  ;;  %v435_v1 = vld [vmem:[%s1125_s3] sm:$0x1] }
 0x122   :  { %v836_v2 = vpop.eup %835  ;;  %855 = vtanh.f32 %v1022_v57 }
 0x123   :  { %399 = vrot.lane.b32.xlu0 %v836_v2, %s870_s0  ;;  %v838_v10 = vpop.eup %837  ;;  %857 = vtanh.f32 %v1025_v63  ;;  %v442_v2 = vlaneseq }
 0x124   :  { %v840_v12 = vpop.eup %839  ;;  %859 = vtanh.f32 %v1030_v7 }
 0x125   :  { %v842_v30 = vpop.eup %841  ;;  %861 = vtanh.f32 %v1034_v11  ;;  %v443_v4 = vshrl.u32 %v442_v2, 7 }
 0x126   :  { %v844_v36 = vpop.eup %843  ;;  %863 = vtanh.f32 %v1039_v18 }
 0x127   :  { %439 = vperm.xlu0 %772, %v436_v8   ;;  %v846_v42 = vpop.eup %845  ;;  %865 = vtanh.f32 %v1043_v25  ;;  %v444_v5 = vsub.s32 0, %v443_v4 }
 0x128   :  { %v848_v20 = vpop.eup %847  ;;  %867 = vtanh.f32 %v1049_v33 }
 0x129   :  { %v850_v29 = vpop.eup %849 }
 0x12a   :  { %v852_v34 = vpop.eup %851 }
 0x12b   :  { %v854_v57 = vpop.eup %853 }
 0x12c   :  { %v856_v43 = vpop.eup %855 }
 0x12d   :  { %v858_v47 = vpop.eup %857 }
 0x12e   :  { %v860_v48 = vpop.eup %859 }
 0x12f   :  { %v862_v52 = vpop.eup %861 }
 0x130   :  { %v864_v54 = vpop.eup %863 }
 0x131   :  { %v866_v59 = vpop.eup %865 }
 0x132   :  { %v868_v61 = vpop.eup %867 }
 0x16f   :  { %v372_v9 = vpop.permute.xlu0 %371 }
 0x170   :  { %v419_v15 = vmul.f32 %v840_v12, %v372_v9 }
 0x173   :  { %v376_v13 = vpop.permute.xlu1 %375  ;;  %v374_v14 = vpop.permute.xlu0 %373 }
 0x174   :  { %v420_v24 = vmul.f32 %v838_v10, %v374_v14  ;;  %v421_v17 = vmul.f32 %v844_v36, %v376_v13 }
 0x176   :  { %v736_v32 = vpack.c.bf16 %v420_v24, %v419_v15 }
 0x177   :  { %v378_v38 = vpop.permute.xlu1 %377  ;;  %v380_v16 = vpop.permute.xlu0 %379 }
 0x178   :  { %v422_v19 = vmul.f32 %v842_v30, %v378_v38  ;;  %738 = vmatpush3.bf16.xpose.msk.msra.mxu1 %vm1079_vm3, %v736_v32  ;;  %v423_v23 = vmul.f32 %v848_v20, %v380_v16 }
 0x179   :  { %739 = vmatprep.subr.bf16.mxu1 %v869_v3 }
 0x17a   :  { %v740_v44 = vpack.c.bf16 %v422_v19, %v421_v17 }
 0x17b   :  { %v382_v21 = vpop.permute.xlu1 %381 }
 0x17c   :  { %v424_v27 = vmul.f32 %v846_v42, %v382_v21 }
 0x17d   :  { %v384_v28 = vpop.permute.xlu0 %383 }
 0x17e   :  { %v744_v31 = vpack.c.bf16 %v424_v27, %v423_v23  ;;  %v425_v37 = vmul.f32 %v852_v34, %v384_v28 }
 0x17f   :  { %v386_v35 = vpop.permute.xlu1 %385 }
 0x180   :  { %v426_v39 = vmul.f32 %v850_v29, %v386_v35  ;;  %742 = vmatpush3.bf16.xpose.msk.msra.mxu1 %vm1079_vm3, %v740_v44 }
 0x181   :  { %743 = vmatprep.subr.bf16.mxu1 %v869_v3 }
 0x182   :  { %v748_v51 = vpack.c.bf16 %v426_v39, %v425_v37 }
 0x183   :  { %v390_v40 = vpop.permute.xlu1 %389 }
 0x184   :  { %v428_v41 = vmul.f32 %v854_v57, %v390_v40 }
 0x185   :  { %v388_v45 = vpop.permute.xlu0 %387 }
 0x186   :  { %v427_v63 = vmul.f32 %v856_v43, %v388_v45 }
 0x187   :  { %v394_v46 = vpop.permute.xlu1 %393 }
 0x188   :  { %v752_v22 = vpack.c.bf16 %v428_v41, %v427_v63  ;;  %746 = vmatpush3.bf16.xpose.msk.msra.mxu1 %vm1079_vm3, %v744_v31  ;;  %v430_v7 = vmul.f32 %v858_v47, %v394_v46 }
 0x189   :  { %747 = vmatprep.subr.bf16.mxu1 %v869_v3 }
 0x18b   :  { %v392_v49 = vpop.permute.xlu0 %391 }
 0x18c   :  { %v429_v11 = vmul.f32 %v860_v48, %v392_v49  ;;  %v398_v50 = vpop.permute.xlu1 %397 }
 0x18d   :  { %v432_v53 = vmul.f32 %v862_v52, %v398_v50 }
 0x18e   :  { %v756_v18 = vpack.c.bf16 %v430_v7, %v429_v11 }
 0x18f   :  { %v396_v55 = vpop.permute.xlu0 %395 }
 0x190   :  { %750 = vmatpush3.bf16.xpose.msk.msra.mxu1 %vm1079_vm3, %v748_v51  ;;  %v431_v56 = vmul.f32 %v864_v54, %v396_v55 }
 0x191   :  { %751 = vmatprep.subr.bf16.mxu1 %v869_v3 }
 0x192   :  { %v760_v58 = vpack.c.bf16 %v432_v53, %v431_v56 }
 0x193   :  { %v402_v25 = vpop.permute.xlu1 %401 }
 0x194   :  { %v434_v60 = vmul.f32 %v866_v59, %v402_v25 }
 0x195   :  { %v400_v62 = vpop.permute.xlu0 %399 }
 0x196   :  { %v433_v33 = vmul.f32 %v868_v61, %v400_v62 }
 0x198   :  { %754 = vmatpush3.bf16.xpose.msk.msra.mxu1 %vm1079_vm3, %v752_v22  ;;  %v764_v0 = vpack.c.bf16 %v434_v60, %v433_v33 }
 0x199   :  { %755 = vmatprep.subr.bf16.mxu1 %v869_v3 }
 0x1a0   :  { %758 = vmatpush3.bf16.xpose.msk.msra.mxu1 %vm1079_vm3, %v756_v18 }
 0x1a1   :  { %759 = vmatprep.subr.bf16.mxu1 %v869_v3 }
 0x1a6   :  { %v440_v6 = vpop.permute.xlu0 %439 }
 0x1a7   :  { %v445_v8 = vrot.slane %v440_v6, %v444_v5 }
 0x1a8   :  { %762 = vmatpush3.bf16.xpose.msk.msra.mxu1 %vm1079_vm3, %v760_v58 }
 0x1a9   :  { %763 = vmatprep.subr.bf16.mxu1 %v869_v3 }
 0x1b0   :  { %766 = vmatpush3.bf16.xpose.msk.msra.mxu1 %vm1079_vm3, %v764_v0 }
 0x1b7   :  { %725 = vmatmul.mubr.msk.f32.vlgmr.msra.gmra.mrb[0].mxu1 %vm446_vm2, %v435_v1 }
 0x28a   :  { %v564_v9 = vpop.f32.mrb[0].mxu1 }
 0x28b   :  { %v565_v10 = vadd.f32 %v564_v9, %v445_v8  ;;  %v726_v12 = vpop.f32.mrb[1].mxu1 }
 0x28d   :  { %568 = vst [vmem:[%s1126_s5] sm:$0x1] %v565_v10 }

</bundles_post_ra>
